<compile_context>
chip_gen: v5e
topology: v5e:2x2
jax: 0.10.0
libtpu: 0.0.40
codegen_flags: <defaults>
</compile_context>

<pallas_src>
import numpy as np
import jax
import jax.numpy as jnp
from jax import lax
from jax.experimental import pallas as pl
from jax.experimental.pallas import tpu as pltpu

EPS = float(np.finfo(np.float64).eps)   # torch.finfo(float).eps
SQRT2 = 2.0 ** 0.5


# ---------------------------------------------------------------------------
# VMEM budget / tile sizing
# ---------------------------------------------------------------------------
def _vmem_budget_bytes():
    """~75% of this generation's VMEM (v5e/v6e: 128 MiB, v7x: 64 MiB per core)."""
    try:
        cap = int(pltpu.get_tpu_info().vmem_capacity_bytes)
    except Exception:
        cap = 64 << 20                    # conservative (v7x per-core) fallback
    return min((cap * 3) // 4, 96 << 20)


def _choose_tile_rows(bf, l, itemsize, n_streams, vmem_budget,
                      max_tile_bytes=4 << 20):
    """Tile height: as tall as the VMEM budget / per-stream byte cap allow,
    aligned to the sublane packing factor of the input dtype."""
    align = 8 * max(1, 4 // max(1, itemsize))     # f32: 8, bf16: 16, int8: 32
    in_row_bytes = n_streams * l * itemsize       # streamed input bytes per row
    out_row_bytes = 128 * 4                       # (T, NS) block pads to 128 lanes
    row_bytes = in_row_bytes + out_row_bytes
    # double-buffered, keep a few MiB of headroom below the scoped limit
    budget_rows = max(align, (vmem_budget - (4 << 20)) // (2 * row_bytes))
    cap_rows = max(align, max_tile_bytes // max(1, l * itemsize))
    t = min(bf, budget_rows, cap_rows)
    t = (t // align) * align
    if t < align:
        t = align
    if t >= bf:
        return bf     # one full-height block (block == full dim is always legal)
    return t


# ---------------------------------------------------------------------------
# Streaming kernel: per-frame reductions only (fully parallel grid axis)
# ---------------------------------------------------------------------------
def _make_stream_kernel(use_snr):
    def kernel(*refs):
        if use_snr:
            ds_ref, dn_ref, tlc_ref, cl_ref, nz_ref, out_ref = refs
        else:
            ds_ref, dn_ref, tlc_ref, out_ref = refs
            cl_ref = nz_ref = None

        # Native dtype in, cast after load (no wrapper-side upcast traffic).
        ds = ds_ref[...].astype(jnp.float32)      # denoised_signal tile (T, L)
        dn = dn_ref[...].astype(jnp.float32)      # denoised_noise  tile (T, L)
        tlc = tlc_ref[...].astype(jnp.float32)    # to_loss_clean   tile (T, L)
        diff = ds - tlc

        # Per-frame (per-row) lane reductions; this grid step owns a disjoint
        # row range of the stats output, so there is no cross-step dependency.
        out_ref[:, 0:1] = jnp.sum(tlc * tlc, axis=1, keepdims=True)    # energy
        out_ref[:, 1:2] = jnp.sum(diff * diff, axis=1, keepdims=True)  # sq err
        out_ref[:, 2:3] = jnp.sum(dn * dn, axis=1, keepdims=True)      # dn^2
        if use_snr:
            cl = cl_ref[...].astype(jnp.float32)
            nz = nz_ref[...].astype(jnp.float32)
            out_ref[:, 3:4] = jnp.sum(cl * cl, axis=1, keepdims=True)
            out_ref[:, 4:5] = jnp.sum(nz * nz, axis=1, keepdims=True)
    return kernel


# ---------------------------------------------------------------------------
# WaveletLoss kernel (tiny, single invocation)
# ---------------------------------------------------------------------------
def _wavelet_kernel(hi_row_ref, hi_col_ref, lo_row_ref, lo_col_ref, out_ref):
    k = hi_row_ref.shape[-1]
    hi_row = hi_row_ref[...]      # (1, K)
    hi_col = hi_col_ref[...]      # (K, 1)
    lo_row = lo_row_ref[...]      # (1, K)
    lo_col = lo_col_ref[...]      # (K, 1)

    ki = lax.broadcasted_iota(jnp.int32, (k, k), 0)
    kj = lax.broadcasted_iota(jnp.int32, (k, k), 1)

    def lag_sum(outer, lag):
        # sum_i w1[i] * w2[i + lag] over the valid range, as a masked (K,K) sum
        return jnp.sum(jnp.where((kj - ki) == lag, outer, 0.0), keepdims=True)

    o_hh = hi_col * hi_row
    o_ll = lo_col * lo_row
    o_lh = lo_col * hi_row

    r1 = (jnp.sum(hi_row * hi_row, keepdims=True) - 1.0) ** 2
    r2 = (jnp.sum(lo_row * lo_row, keepdims=True) - 1.0) ** 2
    for m in range(1, k // 2):
        r1 = r1 + lag_sum(o_hh, 2 * m) ** 2
        r2 = r2 + lag_sum(o_ll, 2 * m) ** 2
    r3 = jnp.sum(hi_row, keepdims=True) ** 2
    r4 = (jnp.sum(lo_row, keepdims=True) - SQRT2) ** 2
    r5 = jnp.zeros((1, 1), jnp.float32)
    for m in range(0, k // 2):
        r5 = r5 + lag_sum(o_lh, 2 * m) ** 2
    out_ref[...] = r1 + r2 + r3 + r4 + r5


def wavelet_loss(hi, lo):
    """WaveletLoss.forward on hi/lo filters of shape (1, 1, K)."""
    k = int(hi.shape[-1])
    hi_row = hi.reshape(1, k).astype(jnp.float32)
    hi_col = hi.reshape(k, 1).astype(jnp.float32)
    lo_row = lo.reshape(1, k).astype(jnp.float32)
    lo_col = lo.reshape(k, 1).astype(jnp.float32)
    out = pl.pallas_call(
        _wavelet_kernel,
        out_shape=jax.ShapeDtypeStruct((1, 1), jnp.float32),
    )(hi_row, hi_col, lo_row, lo_col)
    return out[0, 0]


# ---------------------------------------------------------------------------
# DenoiserLoss forward
# ---------------------------------------------------------------------------
def denoiser_loss(denoised_signal, denoised_noise, to_loss_clean,
                  clean=None, noise=None, *, hi, lo, wavelet_reg,
                  alfa=None, beta=None, max_tile_bytes=4 << 20):
    assert alfa is not None or beta is not None, "alfa or beta must be defined"
    B, F, L = denoised_signal.shape
    BF = B * F
    use_snr = alfa is None
    if use_snr:
        assert clean is not None and noise is not None
    n_streams = 5 if use_snr else 3
    NS = 5 if use_snr else 3

    itemsize = jnp.dtype(denoised_signal.dtype).itemsize
    vmem_budget = _vmem_budget_bytes()
    T = _choose_tile_rows(BF, L, itemsize, n_streams, vmem_budget, max_tile_bytes)
    num_tiles = pl.cdiv(BF, T)   # partial last tile is fine (row-independent math)

    # Free (metadata-only) reshapes; dtype cast happens inside the kernel.
    inputs = [denoised_signal.reshape(BF, L),
              denoised_noise.reshape(BF, L),
              to_loss_clean.reshape(BF, L)]
    if use_snr:
        inputs += [clean.reshape(BF, L), noise.reshape(BF, L)]

    sig_spec = pl.BlockSpec((T, L), lambda t: (t, 0))
    out_spec = pl.BlockSpec((T, NS), lambda t: (t, 0))

    stats = pl.pallas_call(
        _make_stream_kernel(use_snr),
        out_shape=jax.ShapeDtypeStruct((BF, NS), jnp.float32),
        grid=(num_tiles,),
        in_specs=[sig_spec] * len(inputs),
        out_specs=out_spec,
        compiler_params=pltpu.CompilerParams(
            # No cross-step state -> the row axis is truly parallel (v7x: both
            # TensorCores stream half the rows each; v5e/v6e: plain loop).
            dimension_semantics=("parallel",),
            vmem_limit_bytes=int(vmem_budget)),
    )(*inputs)

    # ---- WaveletLoss: tiny dedicated Pallas kernel on the filter taps ------
    wl = wavelet_loss(hi, lo)

    # ---- lightweight plain-XLA epilogue on the (B, F) per-frame stats ------
    fe = stats[:, 0].reshape(B, F)
    se = stats[:, 1].reshape(B, F)
    # sum(x^2 + EPS) == sum(x^2) + L*EPS (EPS hoisted out of the hot loop)
    frame_rms = 10.0 * jnp.log10(fe + float(L) * EPS)
    threshold = jnp.max(frame_rms) - 30.0
    # 3-tap [1/3,1/3,1/3] conv1d with zero padding at each batch's edges.
    padded = jnp.pad(frame_rms, ((0, 0), (1, 1)))
    smoothed = (padded[:, :-2] + padded[:, 1:-1] + padded[:, 2:]) * (1.0 / 3.0)
    mask = smoothed > threshold
    count = jnp.sum(mask.astype(jnp.float32))
    # NOTE: an all-False mask divides by zero -> NaN, matching the torch
    # reference's MSE over an empty selection.
    speech_loss = jnp.sum(jnp.where(mask, se, 0.0)) / (count * float(L))
    noise_loss = jnp.sum(stats[:, 2]) * (1.0 / float(B * F * L))

    if use_snr:
        snr = 10.0 * jnp.log10(jnp.sum(stats[:, 3]) / jnp.sum(stats[:, 4]))
        a = snr / (snr + float(beta))
    else:
        a = jnp.float32(alfa)

    total = a * speech_loss + (1.0 - a) * noise_loss + float(wavelet_reg) * wl
    # TODO(synk): net_reg L2-over-network-parameters branch omitted (net=None).
    return total, speech_loss, noise_loss, wl


# ---------------------- pure-JAX reference (mirrors torch) -------------------
def _reference(ds, dn, tlc, cl, nz, hi, lo, wavelet_reg, alfa, beta):
    hi1 = hi.reshape(-1).astype(jnp.float32)
    lo1 = lo.reshape(-1).astype(jnp.float32)
    K = hi1.shape[0]

    def orth(w1, w2=None):
        if w2 is None:
            w2, start, r = w1, 1, (jnp.sum(w1 ** 2) - 1.0) ** 2
        else:
            start, r = 0, jnp.float32(0.0)
        for m in range(start, K // 2):
            r = r + jnp.sum(w1[:K - 2 * m] * w2[2 * m:]) ** 2
        return r

    wl = (orth(hi1) + orth(lo1) + jnp.sum(hi1) ** 2
          + (jnp.sum(lo1) - SQRT2) ** 2 + orth(lo1, hi1))

    fe = jnp.sum(tlc ** 2 + EPS, axis=2)
    fr = 10.0 * jnp.log10(fe)
    th = fr.max() - 30.0
    k = jnp.array([1 / 3, 1 / 3, 1 / 3], jnp.float32)
    sm = jnp.stack([jnp.convolve(fr[b], k, mode="same") for b in range(fr.shape[0])])
    mask = sm > th

    diff2 = (ds - tlc) ** 2
    speech = jnp.sum(jnp.where(mask[..., None], diff2, 0.0)) / (
        jnp.sum(mask) * ds.shape[2])
    noise_l = jnp.mean(dn ** 2)
    if alfa is None:
        snr = 10.0 * jnp.log10(jnp.sum(cl ** 2) / jnp.sum(nz ** 2))
        a = snr / (snr + beta)
    else:
        a = alfa
    total = a * speech + (1.0 - a) * noise_l + wavelet_reg * wl
    return total, speech, noise_l, wl


if __name__ == "__main__":
    key = jax.random.PRNGKey(0)
    kds, kdn, ktc, kcl, knz, khi, klo = jax.random.split(key, 7)

    B, F, L, K = 2, 24, 128, 8   # batch, frames, frame_len, wavelet taps

    denoised_signal = jax.random.normal(kds, (B, F, L), jnp.float32)
    denoised_noise = 0.1 * jax.random.normal(kdn, (B, F, L), jnp.float32)
    to_loss_clean = jax.random.normal(ktc, (B, F, L), jnp.float32)
    clean = jax.random.normal(kcl, (B, F, L), jnp.float32)
    noise = 0.3 * jax.random.normal(knz, (B, F, L), jnp.float32)

    # Deterministic synthetic wavelet filters, torch shape (1, 1, K).
    hi = 0.3 * jax.random.normal(khi, (1, 1, K), jnp.float32)
    lo = 0.3 * jax.random.normal(klo, (1, 1, K), jnp.float32)

    wavelet_reg, beta = 0.01, 10.0

    def check(got, ref):
        for g, r in zip(got, ref):
            np.testing.assert_allclose(np.asarray(g), np.asarray(r),
                                       rtol=1e-3, atol=1e-4)

    # 1) alfa derived from SNR, multi-tile grid (small byte cap -> T=16, grid=3)
    outs = denoiser_loss(denoised_signal, denoised_noise, to_loss_clean,
                         clean, noise, hi=hi, lo=lo,
                         wavelet_reg=wavelet_reg, alfa=None, beta=beta,
                         max_tile_bytes=8 * 1024)
    outs = jax.block_until_ready(outs)
    check(outs, _reference(denoised_signal, denoised_noise, to_loss_clean,
                           clean, noise, hi, lo, wavelet_reg, None, beta))

    # 2) static alfa + awkward B*F (42 rows, T=16 -> partial last tile)
    Fr = 21
    ds_r = denoised_signal[:, :Fr]
    dn_r = denoised_noise[:, :Fr]
    tlc_r = to_loss_clean[:, :Fr]
    outs2 = denoiser_loss(ds_r, dn_r, tlc_r, hi=hi, lo=lo,
                          wavelet_reg=wavelet_reg, alfa=0.7, beta=None,
                          max_tile_bytes=8 * 1024)
    outs2 = jax.block_until_ready(outs2)
    check(outs2, _reference(ds_r, dn_r, tlc_r, clean, noise,
                            hi, lo, wavelet_reg, 0.7, beta))

    # 3) default tile budget (get_tpu_info-derived, single full-height block here)
    outs3 = denoiser_loss(denoised_signal, denoised_noise, to_loss_clean,
                          hi=hi, lo=lo, wavelet_reg=wavelet_reg,
                          alfa=0.7, beta=None)
    outs3 = jax.block_until_ready(outs3)
    check(outs3, _reference(denoised_signal, denoised_noise, to_loss_clean,
                            clean, noise, hi, lo, wavelet_reg, 0.7, beta))

    print("KERNEL_OK")
</pallas_src>

<mosaic_0001>
module attributes {stable_mosaic.version = 11 : i64} {
  func.func @kernel(%arg0: i32, %arg1: memref<16x128xf32, #tpu.memory_space<vmem>>, %arg2: memref<16x128xf32, #tpu.memory_space<vmem>>, %arg3: memref<16x128xf32, #tpu.memory_space<vmem>>, %arg4: memref<16x128xf32, #tpu.memory_space<vmem>>, %arg5: memref<16x128xf32, #tpu.memory_space<vmem>>, %arg6: memref<16x5xf32, #tpu.memory_space<vmem>>) attributes {dimension_semantics = [#tpu.dimension_semantics<parallel>], iteration_bounds = array<i64: 3>, scalar_prefetch = 0 : i64, scratch_operands = 0 : i64, tpu.core_type = #tpu.core_type<tc>, window_params = [{transform_indices = @transform_0, window_bounds = array<i64: 16, 128>}, {transform_indices = @transform_1, window_bounds = array<i64: 16, 128>}, {transform_indices = @transform_2, window_bounds = array<i64: 16, 128>}, {transform_indices = @transform_3, window_bounds = array<i64: 16, 128>}, {transform_indices = @transform_4, window_bounds = array<i64: 16, 128>}, {transform_indices = @transform_5, window_bounds = array<i64: 16, 5>}]} {
    %c0 = arith.constant 0 : index
    %c0_0 = arith.constant 0 : index
    %0 = vector.load %arg1[%c0, %c0_0] : memref<16x128xf32, #tpu.memory_space<vmem>>, vector<16x128xf32>
    %c0_1 = arith.constant 0 : index
    %c0_2 = arith.constant 0 : index
    %1 = vector.load %arg2[%c0_1, %c0_2] : memref<16x128xf32, #tpu.memory_space<vmem>>, vector<16x128xf32>
    %c0_3 = arith.constant 0 : index
    %c0_4 = arith.constant 0 : index
    %2 = vector.load %arg3[%c0_3, %c0_4] : memref<16x128xf32, #tpu.memory_space<vmem>>, vector<16x128xf32>
    %3 = arith.subf %0, %2 : vector<16x128xf32>
    %4 = arith.mulf %2, %2 : vector<16x128xf32>
    %cst = arith.constant dense<0.000000e+00> : vector<16xf32>
    %5 = vector.multi_reduction <add>, %4, %cst [1] : vector<16x128xf32> to vector<16xf32>
    %6 = vector.shape_cast %5 : vector<16xf32> to vector<16x1xf32>
    %c0_5 = arith.constant 0 : index
    %c0_6 = arith.constant 0 : index
    %7 = vector.load %arg6[%c0_5, %c0_6] : memref<16x5xf32, #tpu.memory_space<vmem>>, vector<16x1xf32>
    tpu.vector_store %arg6[%c0_5, %c0_6], %6 {strides = array<i32>} : memref<16x5xf32, #tpu.memory_space<vmem>>, vector<16x1xf32>,
    %8 = arith.mulf %3, %3 : vector<16x128xf32>
    %cst_7 = arith.constant dense<0.000000e+00> : vector<16xf32>
    %9 = vector.multi_reduction <add>, %8, %cst_7 [1] : vector<16x128xf32> to vector<16xf32>
    %10 = vector.shape_cast %9 : vector<16xf32> to vector<16x1xf32>
    %c0_8 = arith.constant 0 : index
    %c1 = arith.constant 1 : index
    %11 = vector.load %arg6[%c0_8, %c1] : memref<16x5xf32, #tpu.memory_space<vmem>>, vector<16x1xf32>
    tpu.vector_store %arg6[%c0_8, %c1], %10 {strides = array<i32>} : memref<16x5xf32, #tpu.memory_space<vmem>>, vector<16x1xf32>,
    %12 = arith.mulf %1, %1 : vector<16x128xf32>
    %cst_9 = arith.constant dense<0.000000e+00> : vector<16xf32>
    %13 = vector.multi_reduction <add>, %12, %cst_9 [1] : vector<16x128xf32> to vector<16xf32>
    %14 = vector.shape_cast %13 : vector<16xf32> to vector<16x1xf32>
    %c0_10 = arith.constant 0 : index
    %c2 = arith.constant 2 : index
    %15 = vector.load %arg6[%c0_10, %c2] : memref<16x5xf32, #tpu.memory_space<vmem>>, vector<16x1xf32>
    tpu.vector_store %arg6[%c0_10, %c2], %14 {strides = array<i32>} : memref<16x5xf32, #tpu.memory_space<vmem>>, vector<16x1xf32>,
    %c0_11 = arith.constant 0 : index
    %c0_12 = arith.constant 0 : index
    %16 = vector.load %arg4[%c0_11, %c0_12] : memref<16x128xf32, #tpu.memory_space<vmem>>, vector<16x128xf32>
    %c0_13 = arith.constant 0 : index
    %c0_14 = arith.constant 0 : index
    %17 = vector.load %arg5[%c0_13, %c0_14] : memref<16x128xf32, #tpu.memory_space<vmem>>, vector<16x128xf32>
    %18 = arith.mulf %16, %16 : vector<16x128xf32>
    %cst_15 = arith.constant dense<0.000000e+00> : vector<16xf32>
    %19 = vector.multi_reduction <add>, %18, %cst_15 [1] : vector<16x128xf32> to vector<16xf32>
    %20 = vector.shape_cast %19 : vector<16xf32> to vector<16x1xf32>
    %c0_16 = arith.constant 0 : index
    %c3 = arith.constant 3 : index
    %21 = vector.load %arg6[%c0_16, %c3] : memref<16x5xf32, #tpu.memory_space<vmem>>, vector<16x1xf32>
    tpu.vector_store %arg6[%c0_16, %c3], %20 {strides = array<i32>} : memref<16x5xf32, #tpu.memory_space<vmem>>, vector<16x1xf32>,
    %22 = arith.mulf %17, %17 : vector<16x128xf32>
    %cst_17 = arith.constant dense<0.000000e+00> : vector<16xf32>
    %23 = vector.multi_reduction <add>, %22, %cst_17 [1] : vector<16x128xf32> to vector<16xf32>
    %24 = vector.shape_cast %23 : vector<16xf32> to vector<16x1xf32>
    %c0_18 = arith.constant 0 : index
    %c4 = arith.constant 4 : index
    %25 = vector.load %arg6[%c0_18, %c4] : memref<16x5xf32, #tpu.memory_space<vmem>>, vector<16x1xf32>
    tpu.vector_store %arg6[%c0_18, %c4], %24 {strides = array<i32>} : memref<16x5xf32, #tpu.memory_space<vmem>>, vector<16x1xf32>,
    return
  }
  func.func @transform_0(%arg0: i32) -> (i32, i32) {
    %c0_i32 = arith.constant 0 : i32
    %c0_i32_0 = arith.constant 0 : i32
    return %arg0, %c0_i32 : i32, i32
  }
  func.func @transform_1(%arg0: i32) -> (i32, i32) {
    %c0_i32 = arith.constant 0 : i32
    %c0_i32_0 = arith.constant 0 : i32
    return %arg0, %c0_i32 : i32, i32
  }
  func.func @transform_2(%arg0: i32) -> (i32, i32) {
    %c0_i32 = arith.constant 0 : i32
    %c0_i32_0 = arith.constant 0 : i32
    return %arg0, %c0_i32 : i32, i32
  }
  func.func @transform_3(%arg0: i32) -> (i32, i32) {
    %c0_i32 = arith.constant 0 : i32
    %c0_i32_0 = arith.constant 0 : i32
    return %arg0, %c0_i32 : i32, i32
  }
  func.func @transform_4(%arg0: i32) -> (i32, i32) {
    %c0_i32 = arith.constant 0 : i32
    %c0_i32_0 = arith.constant 0 : i32
    return %arg0, %c0_i32 : i32, i32
  }
  func.func @transform_5(%arg0: i32) -> (i32, i32) {
    %c0_i32 = arith.constant 0 : i32
    %c0_i32_0 = arith.constant 0 : i32
    return %arg0, %c0_i32 : i32, i32
  }
}

</mosaic_0001>

<bundles_post_ra>
// kernel: tpu_custom_call.1
= control target key start
LH: loop header
LB: loop body
LE: loop exit
PB: predicated region body
PF: predicated region fallthrough
CT: control target
= control target key end

     0   :  { %s1155_s0 = inlined_call_operand.hbm [shape: f32[48,128], index: 0, kind: input, shape index: {}]   ;;  %s1156_s1 = inlined_call_operand.hbm [shape: f32[48,128], index: 1, kind: input, shape index: {}]   ;;  %s1157_s2 = inlined_call_operand.hbm [shape: f32[48,128], index: 2, kind: input, shape index: {}]   ;;  %s1158_s3 = inlined_call_operand.hbm [shape: f32[48,128], index: 3, kind: input, shape index: {}]   ;;  %s1159_s4 = inlined_call_operand.hbm [shape: f32[48,128], index: 4, kind: input, shape index: {}]   ;;  %s1160_s5 = inlined_call_operand.vmem [shape: f32[48,5], index: 5, kind: output, shape index: {}]  }
   0x1   :  { %1164 = sst [smem:[#allocation14_spill]] %s1156_s1 }
   0x2   :  { %1165 = sst [smem:[#allocation15_spill]] %s1158_s3 }
   0x3   :  { %10 = vsyncpa [#allocation3], 0 }
   0x4   :  { %12 = vsyncpa [#allocation3 + $0x1], 0 }
   0x5   :  { %13 = vsyncpa [#allocation5], 0 }
   0x6   :  { %15 = vsyncpa [#allocation5 + $0x1], 0 }
   0x7   :  { %16 = vsyncpa [#allocation8], 0 }
   0x8   :  { %18 = vsyncpa [#allocation8 + $0x1], 0  ;;  %s946_s18 = smov 0   ;;  %s948_s19 = smov 0  }
   0x9   :  { %s950_s20 = smov 0   ;;  %s952_s21 = smov 0  }
   0xa LB: > { %s965_s22 = sadd.s32 4294967295, %s912_s21   ;;  %s968_s23 = sadd.s32 1, %s912_s21   ;;  %s912_s21 = sphi %s952_s21, %s1179_s21   ;;  %s908_s20 = sphi %s950_s20, %s1178_s20   ;;  %s904_s19 = sphi %s948_s19, %s1177_s19   ;;  %s900_s18 = sphi %s946_s18, %s1176_s18  }
   0xb   : > { %s28_s24 = ssub.s32 %s912_s21, %s968_s23  ;;  %s31_s25 = sadd.s32 1, %s908_s20 }
   0xc   : > { %p29_p0 = scmp.eq.s32.totalorder %s28_s24, 0  ;;  %p38_p1 = scmp.ne.s32.totalorder %s908_s20, %s904_s19 }
   0xd   : > { %p39_p2 = scmp.eq.s32.totalorder %s912_s21, 0  ;;  %p44_p3 = scmp.ne.s32.totalorder %s904_s19, %s900_s18 }
   0xe   : > { %s978_s26 = scalar_select %p29_p0, %s908_s20, %s31_s25  }
   0xf   : > { %p40_p4 = por %p39_p2, %p38_p1  ;;  %p45_p5 = scmp.eq.s32.totalorder %s965_s22, 0 }
  0x10   : > { %1166 = sst [smem:[#allocation13_spill]] %s978_s26  ;;  %p685_p6 = scmp.lt.s32.totalorder %s912_s21, 3 }
  0x11   : > { %p982_p7 = por %p45_p5, %p44_p3  ;;  %s1161_s28 = sand.u32 1, %s908_s20  }
  0x12   : > { %s989_s29 = sshll.u32 %s1161_s28, 4  ;;  %s992_s30 = sshll.u32 %s912_s21, 4 }
  0x13   : > { %p994_p8 = pnand %p685_p6, %p40_p4  ;;  %s220_s7 = sand.u32 1, %s912_s21  }
  0x14   : > { %s1169_s1 = sld [smem:[#allocation14_spill]]  ;;  %s224_s12 = scalar_lea.vmem [#allocation4], %s989_s29 }
  0x15   : > { %s232_s13 = sshll.u32 %s224_s12, 4  ;;  %s1006_s14 = scalar_lea.sflag [#allocation5], %s220_s7  ;;  %s233_s13 = int_to_ptr.vmem [resolvable:$true] %s232_s13 }
  0x16   : > { %p1010_p10 = pneg %p994_p8 }
  0x1a   : > { %s229_s10 = scalar_lea.hbm %s1169_s1, %s992_s30  ;;  %s727_s25 = scalar_lea.hbm %s1169_s1, 48 }
  0x1b   : > { %s230_s11 = sshll.u32 %s229_s10, 4  ;;  %s231_s11 = int_to_ptr.hbm [resolvable:$true] %s230_s11 }
  0x1c   : > { %s720_s15 = sshra.s32 %s231_s11, 4  ;;  %s721_s15 = int_to_ptr.hbm [resolvable:$true] %s720_s15 }
  0x1d   : > { %s722_s16 = scalar_lea.hbm %s721_s15, 16  ;;  %p728_p13 = scmp.lt.s32.totalorder %s721_s15, %s1169_s1 }
  0x1e   : > { %p723_p9 = scmp.ne.s32.totalorder %s721_s15, %s722_s16  ;;  %p729_p0 = scmp.lt.s32.totalorder %s727_s25, %s722_s16 }
  0x20   : > { %p725_p11 = pnand %p1010_p10, %p723_p9  ;;  %p730_p1 = por %p729_p0, %p728_p13 }
  0x22   : > { %p726_p12 = pneg %p725_p11 }
  0x24   : > { %p731_p2 = pnand %p730_p1, %p726_p12 }
  0x26   : > { %734 = shalt.err (!%p731_p2)
}
  0x27   : > { %s1162_s10 = smov 128   ;;  %s915_s12 = smov 8  }
  0x28   : > { %675 = dma.hbm_to_vmem [thread:$0]  (!%p994_p8), %s231_s11, 256, %s233_s13, %s1006_s14, %s1162_s10, %s1162_s10, %s915_s12  }
  0x29   : > { %p644_p3 = scmp.ge.s32.totalorder %s912_s21, 1  ;;  %p306_p4 = scmp.lt.s32.totalorder %s912_s21, 4 }
  0x2a   : > { %s1172_s3 = sld [smem:[#allocation15_spill]]  ;;  %s268_s8 = scalar_lea.vmem [#allocation7], %s989_s29 }
  0x2b   : > { %p1030_p5 = pnand %p644_p3, %p306_p4  ;;  %s276_s9 = sshll.u32 %s268_s8, 4  ;;  %s277_s9 = int_to_ptr.vmem [resolvable:$true] %s276_s9 }
  0x2c   : > { %s1041_s28 = scalar_lea.sflag [#allocation8], %s220_s7 }
  0x30   : > { %s273_s24 = scalar_lea.hbm %s1172_s3, %s992_s30  ;;  %s757_s16 = scalar_lea.hbm %s1172_s3, 48 }
  0x31   : > { %s274_s25 = sshll.u32 %s273_s24, 4  ;;  %s275_s25 = int_to_ptr.hbm [resolvable:$true] %s274_s25 }
  0x32   : > { %s750_s1 = sshra.s32 %s275_s25, 4  ;;  %s751_s1 = int_to_ptr.hbm [resolvable:$true] %s750_s1 }
  0x33   : > { %s752_s11 = scalar_lea.hbm %s751_s1, 16  ;;  %p758_p12 = scmp.lt.s32.totalorder %s751_s1, %s1172_s3 }
  0x34   : > { %p753_p6 = scmp.ne.s32.totalorder %s751_s1, %s752_s11  ;;  %p759_p13 = scmp.lt.s32.totalorder %s757_s16, %s752_s11 }
  0x36   : > { %p755_p9 = pnand %p753_p6, %p1010_p10  ;;  %p760_p0 = por %p759_p13, %p758_p12 }
  0x38   : > { %p756_p11 = pneg %p755_p9 }
  0x3a   : > { %p761_p1 = pnand %p760_p0, %p756_p11 }
  0x3c   : > { %764 = shalt.err (!%p761_p1)
}
  0x3d   : > { %s1173_s21 = smov 128   ;;  %s207_s8 = scalar_lea.hbm %s1155_s0, %s992_s30 }
  0x3e   : > { %681 = dma.hbm_to_vmem [thread:$0]  (!%p994_p8), %s275_s25, 256, %s277_s9, %s1041_s28, %s1173_s21, %s1173_s21, %s915_s12  }
  0x3f   : > { %s202_s1 = scalar_lea.vmem [#allocation2], %s989_s29  ;;  %s208_s13 = sshll.u32 %s207_s8, 4  ;;  %s209_s13 = int_to_ptr.hbm [resolvable:$true] %s208_s13 }
  0x40   : > { %s210_s11 = sshll.u32 %s202_s1, 4  ;;  %s1174_s16 = sand.u32 1, %s908_s20   ;;  %s211_s11 = int_to_ptr.vmem [resolvable:$true] %s210_s11 }
  0x41   : > { %s199_s18 = scalar_lea.sflag [#allocation3], %s1174_s16  ;;  %s780_s24 = sshra.s32 %s209_s13, 4  ;;  %s781_s24 = int_to_ptr.hbm [resolvable:$true] %s780_s24 }
  0x42   : > { %s782_s3 = scalar_lea.hbm %s781_s24, 16  ;;  %s787_s9 = scalar_lea.hbm %s1155_s0, 48 }
  0x43   : > { %p783_p2 = scmp.ne.s32.totalorder %s781_s24, %s782_s3  ;;  %p788_p6 = scmp.lt.s32.totalorder %s781_s24, %s1155_s0 }
  0x44   : > { %p789_p9 = scmp.lt.s32.totalorder %s787_s9, %s782_s3 }
  0x45   : > { %p785_p3 = pnand %p783_p2, %p1010_p10 }
  0x46   : > { %p790_p11 = por %p789_p9, %p788_p6 }
  0x47   : > { %p786_p4 = pneg %p785_p3 }
  0x49   : > { %p791_p12 = pnand %p790_p11, %p786_p4 }
  0x4b   : > { %794 = shalt.err (!%p791_p12)
}
  0x4c   : > { %672 = dma.hbm_to_vmem [thread:$0]  (!%p994_p8), %s209_s13, 256, %s211_s11, %s199_s18, %s1173_s21, %s1173_s21, %s915_s12  }
  0x4d   : > { %s251_s1 = scalar_lea.hbm %s1157_s2, %s992_s30  ;;  %s246_s16 = scalar_lea.vmem [#allocation6], %s989_s29 }
  0x4e   : > { %s254_s25 = sshll.u32 %s246_s16, 4  ;;  %s252_s24 = sshll.u32 %s251_s1, 4  ;;  %s255_s25 = int_to_ptr.vmem [resolvable:$true] %s254_s25  ;;  %s253_s24 = int_to_ptr.hbm [resolvable:$true] %s252_s24 }
  0x4f   : > { %s810_s3 = sshra.s32 %s253_s24, 4  ;;  %s817_s11 = scalar_lea.hbm %s1157_s2, 48  ;;  %s811_s3 = int_to_ptr.hbm [resolvable:$true] %s810_s3 }
  0x50   : > { %s812_s9 = scalar_lea.hbm %s811_s3, 16  ;;  %p818_p2 = scmp.lt.s32.totalorder %s811_s3, %s1157_s2 }
  0x51   : > { %p813_p13 = scmp.ne.s32.totalorder %s811_s3, %s812_s9  ;;  %p819_p3 = scmp.lt.s32.totalorder %s817_s11, %s812_s9 }
  0x53   : > { %p815_p0 = pnand %p813_p13, %p1010_p10  ;;  %p820_p4 = por %p819_p3, %p818_p2 }
  0x55   : > { %p816_p1 = pneg %p815_p0 }
  0x57   : > { %p821_p6 = pnand %p820_p4, %p816_p1 }
  0x59   : > { %824 = shalt.err (!%p821_p6)
}
  0x5a   : > { %678 = dma.hbm_to_vmem [thread:$0]  (!%p994_p8), %s253_s24, 256, %s255_s25, %s1006_s14, %s1173_s21, %s1173_s21, %s915_s12  }
  0x5b   : > { %s295_s1 = scalar_lea.hbm %s1159_s4, %s992_s30  ;;  %s290_s16 = scalar_lea.vmem [#allocation9], %s989_s29 }
  0x5c   : > { %s298_s3 = sshll.u32 %s290_s16, 4  ;;  %s296_s9 = sshll.u32 %s295_s1, 4  ;;  %s299_s3 = int_to_ptr.vmem [resolvable:$true] %s298_s3  ;;  %s297_s9 = int_to_ptr.hbm [resolvable:$true] %s296_s9 }
  0x5d   : > { %s840_s7 = sshra.s32 %s297_s9, 4  ;;  %s847_s14 = scalar_lea.hbm %s1159_s4, 48  ;;  %s841_s7 = int_to_ptr.hbm [resolvable:$true] %s840_s7 }
  0x5e   : > { %s842_s10 = scalar_lea.hbm %s841_s7, 16  ;;  %p848_p13 = scmp.lt.s32.totalorder %s841_s7, %s1159_s4 }
  0x5f   : > { %p843_p9 = scmp.ne.s32.totalorder %s841_s7, %s842_s10  ;;  %p849_p0 = scmp.lt.s32.totalorder %s847_s14, %s842_s10 }
  0x61   : > { %p845_p11 = pnand %p843_p9, %p1010_p10  ;;  %p850_p1 = por %p849_p0, %p848_p13 }
  0x63   : > { %p846_p12 = pneg %p845_p11 }
  0x65   : > { %p851_p2 = pnand %p850_p1, %p846_p12 }
  0x67   : > { %854 = shalt.err (!%p851_p2)
}
  0x68   : > { %684 = dma.hbm_to_vmem [thread:$0]  (!%p994_p8), %s297_s9, 256, %s299_s3, %s1041_s28, %s1173_s21, %s1173_s21, %s915_s12  }
  0x69   : > { %310 = sbr.rel (%p1030_p5) target bundleno = 261 (0x105), region = 40  ;;  %s312_s29 = sand.u32 (!%p1030_p5), 1, %s904_s19  }
  0x6a   : > { %s1118_s30 = sshll.u32 (!%p1030_p5), %s312_s29, 4  ;;  %s313_s17 = scalar_lea.sflag (!%p1030_p5), [#allocation3], %s312_s29 }
  0x6b   : > { %s316_s18 = scalar_lea.vmem (!%p1030_p5), [#allocation2], %s1118_s30 }
  0x6e   : > { %887 = dma.done.wait (%p982_p7), %s313_s17, 256  }
  0x6f   : > { %889 = vsyncadd (%p982_p7), %s313_s17, 4294967040  ;;  %s322_s28 = sand.u32 1, %s965_s22   ;;  %s326_s12 = scalar_lea.vmem [#allocation4], %s1118_s30 }
  0x70   : > { %s323_s6 = scalar_lea.sflag [#allocation5], %s322_s28 }
  0x71   : > { %891 = dma.done.wait (%p982_p7), %s323_s6, 512  }
  0x72   : > { %893 = vsyncadd (%p982_p7), %s323_s6, 4294966784  ;;  %s336_s15 = scalar_lea.vmem [#allocation6], %s1118_s30  ;;  %s343_s21 = scalar_lea.sflag [#allocation8], %s322_s28 }
  0x73   : > { %s346_s8 = scalar_lea.vmem [#allocation7], %s1118_s30 }
  0x74   : > { %895 = dma.done.wait (%p982_p7), %s343_s21, 512  }
  0x75   : > { %897 = vsyncadd (%p982_p7), %s343_s21, 4294966784  ;;  %v419_v0 = vld [vmem:[%s336_s15] sm:$0xff]  ;;  %v420_v6 = vld [vmem:[%s336_s15 + $0x8] sm:$0xff]  ;;  %s356_s27 = scalar_lea.vmem [#allocation9], %s1118_s30  ;;  %s650_s26 = sshll.u32 %s965_s22, 1  ;;  %vm429_vm0 = vcmask 7168  }
  0x76   : > { %v415_v1 = vld [vmem:[%s316_s18] sm:$0xff]  ;;  %v423_v3 = vmul.f32 %v419_v0, %v419_v0  ;;  %v416_v7 = vld [vmem:[%s316_s18 + $0x8] sm:$0xff]  ;;  %v424_v11 = vmul.f32 %v420_v6, %v420_v6  ;;  %p410_p7 = scmp.lt.s32.totalorder %s650_s26, 5  ;;  %vm438_vm1 = vcmask 15368   ;;  %vm447_vm2 = vcmask 23568  }
  0x77   : > { %v417_v2 = vld [vmem:[%s326_s12] sm:$0xff]  ;;  %v421_v4 = vsub.f32 %v415_v1, %v419_v0  ;;  %v418_v9 = vld [vmem:[%s326_s12 + $0x8] sm:$0xff]  ;;  %v422_v10 = vsub.f32 %v416_v7, %v420_v6  ;;  %vm460_vm3 = vcmask 31768   ;;  %vm469_vm4 = vcmask 39968  }
  0x78   : > { %v441_v5 = vmul.f32 %v417_v2, %v417_v2  ;;  %425 = vadd.xlane.f32.xlu0 %v423_v3  ;;  %v442_v12 = vmul.f32 %v418_v9, %v418_v9  ;;  %v450_v14 = vld [vmem:[%s346_s8] sm:$0xff]  ;;  %v451_v16 = vld [vmem:[%s346_s8 + $0x8] sm:$0xff]  ;;  %s1181_s26 = smov (!%p410_p7, %s650_s26), 5 }
  0x79   : > { %v432_v8 = vmul.f32 %v421_v4, %v421_v4  ;;  %v433_v13 = vmul.f32 %v422_v10, %v422_v10  ;;  %v452_v15 = vld [vmem:[%s356_s27] sm:$0xff]  ;;  %v454_v17 = vmul.f32 %v450_v14, %v450_v14  ;;  %v455_v19 = vmul.f32 %v451_v16, %v451_v16  ;;  %v453_v20 = vld [vmem:[%s356_s27 + $0x8] sm:$0xff]  ;;  %s651_s1 = sshll.u32 %s1181_s26, 3 }
  0x7a   : > { %443 = vadd.xlane.f32.xlu2 %v441_v5  ;;  %v463_v18 = vmul.f32 %v452_v15, %v452_v15  ;;  %v464_v21 = vmul.f32 %v453_v20, %v453_v20  ;;  %s413_s9 = scalar_lea.vmem %s1160_s5, %s651_s1 }
  0x7b   : > { %434 = vadd.xlane.f32.xlu1 %v432_v8 }
  0x80   : > { %427 = vadd.xlane.f32.xlu0 %v424_v11 }
  0x82   : > { %445 = vadd.xlane.f32.xlu2 %v442_v12 }
  0x83   : > { %436 = vadd.xlane.f32.xlu1 %v433_v13 }
  0x88   : > { %456 = vadd.xlane.f32.xlu0 %v454_v17 }
  0x8a   : > { %465 = vadd.xlane.f32.xlu2 %v463_v18 }
  0x8b   : > { %458 = vadd.xlane.f32.xlu1 %v455_v19 }
  0x90   : > { %467 = vadd.xlane.f32.xlu0 %v464_v21 }
  0xeb   : > { %v426_v22 = vpop.xlane.xlu0 %425 }
  0xec   : > { %430 = vst.msk [vmem:[%s413_s9] sm:$0xff] %vm429_vm0, %v426_v22 }
  0xed   : > { %v444_v23 = vpop.xlane.xlu2 %443 }
  0xee   : > { %v435_v24 = vpop.xlane.xlu1 %434 }
  0xef   : > { %439 = vst.msk [vmem:[%s413_s9] sm:$0xff] %vm438_vm1, %v435_v24 }
  0xf0   : > { %448 = vst.msk [vmem:[%s413_s9] sm:$0xff] %vm447_vm2, %v444_v23 }
  0xf3   : > { %v428_v25 = vpop.xlane.xlu0 %427 }
  0xf4   : > { %431 = vst.msk [vmem:[%s413_s9 + $0x8] sm:$0xff] %vm429_vm0, %v428_v25 }
  0xf5   : > { %v446_v26 = vpop.xlane.xlu2 %445 }
  0xf6   : > { %v437_v27 = vpop.xlane.xlu1 %436 }
  0xf7   : > { %440 = vst.msk [vmem:[%s413_s9 + $0x8] sm:$0xff] %vm438_vm1, %v437_v27 }
  0xf8   : > { %449 = vst.msk [vmem:[%s413_s9 + $0x8] sm:$0xff] %vm447_vm2, %v446_v26 }
  0xfb   : > { %v457_v28 = vpop.xlane.xlu0 %456 }
  0xfc   : > { %461 = vst.msk [vmem:[%s413_s9] sm:$0xff] %vm460_vm3, %v457_v28 }
  0xfd   : > { %v466_v29 = vpop.xlane.xlu2 %465 }
  0xfe   : > { %v459_v30 = vpop.xlane.xlu1 %458  ;;  %470 = vst.msk [vmem:[%s413_s9] sm:$0xff] %vm469_vm4, %v466_v29 }
  0xff   : > { %462 = vst.msk [vmem:[%s413_s9 + $0x8] sm:$0xff] %vm460_vm3, %v459_v30 }
 0x103   : > { %v468_v31 = vpop.xlane.xlu0 %467 }
 0x104   : > { %471 = vst.msk [vmem:[%s413_s9 + $0x8] sm:$0xff] %vm469_vm4, %v468_v31 }
 0x105 PF: > { %s1175_s22 = sld [smem:[#allocation13_spill]]  ;;  %p21_p8 = scmp.ge.s32.totalorder %s968_s23, 5  }
 0x106   : > { %s1176_s18 = smov %s904_s19  ;;  %s1177_s19 = smov %s908_s20 }
 0x107   : > { %s1179_s21 = smov %s968_s23  ;;  %23 = sbr.rel (!%p21_p8) target bundleno = 10 (0xa), region = 128 }
 0x10b   : > { %s1178_s20 = smov %s1175_s22 }
 0x10c   :  { %494 = vsyncpa [#allocation3], 1 }
 0x10d   :  { %496 = vsyncpa [#allocation3 + $0x1], 1 }
 0x10e   :  { %497 = vsyncpa [#allocation5], 1 }
 0x10f   :  { %499 = vsyncpa [#allocation5 + $0x1], 1 }
 0x110   :  { %500 = vsyncpa [#allocation8], 1 }
 0x111   :  { %502 = vsyncpa [#allocation8 + $0x1], 1 }

</bundles_post_ra>
